<compile_context>
chip_gen: v7x
topology: tpu7x:2x2x1
jax: 0.10.0
libtpu: 0.0.40
codegen_flags: <defaults>
</compile_context>

<pallas_src>
import math
from functools import partial

import jax
import jax.numpy as jnp
from jax.experimental import pallas as pl
from jax.experimental.pallas import tpu as pltpu


def _fused_linear_kernel(x_ref, w_ref, b_ref, o_ref, *, num_layers, use_bf16):
    # x_ref: (tm, H), w_ref: (H, H) [already (in, out) layout], b_ref: (1, H),
    # o_ref: (tm, H).  Activation never leaves VMEM/vregs across the 4 layers.
    act = x_ref[...].astype(jnp.float32)
    w = w_ref[...]
    if use_bf16:
        w = w.astype(jnp.bfloat16)
    # Hoisted bias broadcast (done once, not once per unrolled layer).
    bias = jnp.broadcast_to(b_ref[...].astype(jnp.float32), act.shape)
    for _ in range(num_layers):
        lhs = act.astype(jnp.bfloat16) if use_bf16 else act
        act = jnp.dot(lhs, w, preferred_element_type=jnp.float32) + bias
    o_ref[...] = act.astype(o_ref.dtype)


def _round_up(x, m):
    return (x + m - 1) // m * m


@partial(jax.jit, static_argnames=("num_layers", "use_bf16"))
def all_forward(x, w, b, num_layers=4, use_bf16=False):
    """Applies the (cloned, hence identical) Linear layer `num_layers` times.

    x: (B, S, H); w: (H, H) in PyTorch nn.Linear layout (out_features,
    in_features); b: (H,).  One fused Pallas kernel over the flattened
    (B*S, H) slab — no host-side padding, no output slicing.
    """
    B, S, H = x.shape
    M = B * S

    x2d = x.reshape(M, H)
    w_t = jnp.transpose(w)          # one-time host transpose: x @ W.T == x @ w_t
    b2d = b.reshape(1, H)

    # M tile: sublane-aligned, as large as a ~44 MiB VMEM working set allows
    # (worst-case generation is v7x with 64 MiB per-TC VMEM).
    tm = min(1024, _round_up(M, 8))

    def vmem_estimate(tile_m):
        f32 = 4
        est = (2 * 2 * tile_m * H * f32          # x + out double buffers
               + H * H * w.dtype.itemsize        # resident weight (1-buffered)
               + 2 * H * f32                     # bias
               + 3 * tile_m * H * f32)           # in-kernel activation temps
        if use_bf16:
            est += H * H * 2 + tile_m * H * 2    # bf16 copies of w / act
        return est

    while tm > 8 and vmem_estimate(tm) > 44 * 1024 * 1024:
        tm = max(8, tm // 2)

    vmem_limit = int(min(48 * 1024 * 1024,
                         max(32 * 1024 * 1024, int(vmem_estimate(tm) * 1.5))))

    out = pl.pallas_call(
        partial(_fused_linear_kernel, num_layers=num_layers, use_bf16=use_bf16),
        out_shape=jax.ShapeDtypeStruct((M, H), x.dtype),
        grid_spec=pltpu.PrefetchScalarGridSpec(
            num_scalar_prefetch=0,
            grid=(pl.cdiv(M, tm),),
            in_specs=[
                # Activation tile marches along M (tail block clipped by Pallas).
                pl.BlockSpec((tm, H), lambda i: (i, 0)),
                # Weight / bias: constant index_map -> resident, single-buffered.
                pl.BlockSpec((H, H), lambda i: (0, 0),
                             pipeline_mode=pl.Buffered(1)),
                pl.BlockSpec((1, H), lambda i: (0, 0),
                             pipeline_mode=pl.Buffered(1)),
            ],
            out_specs=pl.BlockSpec((tm, H), lambda i: (i, 0)),
        ),
        compiler_params=pltpu.CompilerParams(
            dimension_semantics=("parallel",),   # independent M tiles
            vmem_limit_bytes=vmem_limit,
        ),
    )(x2d, w_t, b2d)

    return out.reshape(B, S, H)


if __name__ == "__main__":
    key = jax.random.PRNGKey(0)
    B, S, H = 2, 8, 32

    kx, kw, kb = jax.random.split(key, 3)
    x = jax.random.normal(kx, (B, S, H), dtype=jnp.float32)

    # Deterministic nn.Linear-style init: U(-1/sqrt(H), 1/sqrt(H)).
    # w is in PyTorch layout (out_features, in_features).
    bound = 1.0 / math.sqrt(H)
    w = jax.random.uniform(kw, (H, H), minval=-bound, maxval=bound,
                           dtype=jnp.float32)
    b = jax.random.uniform(kb, (H,), minval=-bound, maxval=bound,
                           dtype=jnp.float32)

    out = all_forward(x, w, b, num_layers=4)
    jax.block_until_ready(out)

    # Sanity check against plain-JAX reference (nn.Linear semantics: x @ W.T + b).
    ref = x.reshape(B * S, H)
    for _ in range(4):
        ref = ref @ w.T + b
    ref = ref.reshape(B, S, H)
    assert jnp.allclose(out, ref, atol=1e-4, rtol=1e-4)

    print("KERNEL_OK")
</pallas_src>

<mosaic_0001>
module attributes {stable_mosaic.version = 11 : i64} {
  func.func @_fused_linear_kernel(%arg0: i32, %arg1: memref<16x32xf32, #tpu.memory_space<vmem>>, %arg2: memref<32x32xf32, #tpu.memory_space<vmem>>, %arg3: memref<1x32xf32, #tpu.memory_space<vmem>>, %arg4: memref<16x32xf32, #tpu.memory_space<vmem>>) attributes {dimension_semantics = [#tpu.dimension_semantics<parallel>], iteration_bounds = array<i64: 1>, scalar_prefetch = 0 : i64, scratch_operands = 0 : i64, tpu.core_type = #tpu.core_type<tc>, window_params = [{transform_indices = @transform_0, window_bounds = array<i64: 16, 32>}, {pipeline_mode = #tpu.pipeline_mode<synchronous>, transform_indices = @transform_1, window_bounds = array<i64: 32, 32>}, {pipeline_mode = #tpu.pipeline_mode<synchronous>, transform_indices = @transform_2, window_bounds = array<i64: 1, 32>}, {transform_indices = @transform_3, window_bounds = array<i64: 16, 32>}]} {
    %c0 = arith.constant 0 : index
    %c0_0 = arith.constant 0 : index
    %0 = vector.load %arg1[%c0, %c0_0] : memref<16x32xf32, #tpu.memory_space<vmem>>, vector<16x32xf32>
    %c0_1 = arith.constant 0 : index
    %c0_2 = arith.constant 0 : index
    %1 = vector.load %arg2[%c0_1, %c0_2] : memref<32x32xf32, #tpu.memory_space<vmem>>, vector<32x32xf32>
    %c0_3 = arith.constant 0 : index
    %c0_4 = arith.constant 0 : index
    %2 = vector.load %arg3[%c0_3, %c0_4] : memref<1x32xf32, #tpu.memory_space<vmem>>, vector<1x32xf32>
    %3 = vector.shape_cast %2 : vector<1x32xf32> to vector<1x32xf32>
    %4 = vector.broadcast %3 : vector<1x32xf32> to vector<16x32xf32>
    %cst = arith.constant dense<0.000000e+00> : vector<16x32xf32>
    %5 = tpu.matmul %0, %1, %cst {dimension_numbers = #tpu.dot_dimension_numbers<[1], [0], [0], [1], [0, 0, 1, 1], [], []>} : vector<16x32xf32>, vector<32x32xf32>, vector<16x32xf32> -> vector<16x32xf32>
    %6 = arith.addf %5, %4 : vector<16x32xf32>
    %cst_5 = arith.constant dense<0.000000e+00> : vector<16x32xf32>
    %7 = tpu.matmul %6, %1, %cst_5 {dimension_numbers = #tpu.dot_dimension_numbers<[1], [0], [0], [1], [0, 0, 1, 1], [], []>} : vector<16x32xf32>, vector<32x32xf32>, vector<16x32xf32> -> vector<16x32xf32>
    %8 = arith.addf %7, %4 : vector<16x32xf32>
    %cst_6 = arith.constant dense<0.000000e+00> : vector<16x32xf32>
    %9 = tpu.matmul %8, %1, %cst_6 {dimension_numbers = #tpu.dot_dimension_numbers<[1], [0], [0], [1], [0, 0, 1, 1], [], []>} : vector<16x32xf32>, vector<32x32xf32>, vector<16x32xf32> -> vector<16x32xf32>
    %10 = arith.addf %9, %4 : vector<16x32xf32>
    %cst_7 = arith.constant dense<0.000000e+00> : vector<16x32xf32>
    %11 = tpu.matmul %10, %1, %cst_7 {dimension_numbers = #tpu.dot_dimension_numbers<[1], [0], [0], [1], [0, 0, 1, 1], [], []>} : vector<16x32xf32>, vector<32x32xf32>, vector<16x32xf32> -> vector<16x32xf32>
    %12 = arith.addf %11, %4 : vector<16x32xf32>
    %c0_8 = arith.constant 0 : index
    %c0_9 = arith.constant 0 : index
    %13 = vector.load %arg4[%c0_8, %c0_9] : memref<16x32xf32, #tpu.memory_space<vmem>>, vector<16x32xf32>
    tpu.vector_store %arg4[%c0_8, %c0_9], %12 {strides = array<i32>} : memref<16x32xf32, #tpu.memory_space<vmem>>, vector<16x32xf32>,
    return
  }
  func.func @transform_0(%arg0: i32) -> (i32, i32) {
    %c0_i32 = arith.constant 0 : i32
    %c0_i32_0 = arith.constant 0 : i32
    return %arg0, %c0_i32 : i32, i32
  }
  func.func @transform_1(%arg0: i32) -> (i32, i32) {
    %c0_i32 = arith.constant 0 : i32
    %c0_i32_0 = arith.constant 0 : i32
    %c0_i32_1 = arith.constant 0 : i32
    return %c0_i32, %c0_i32_0 : i32, i32
  }
  func.func @transform_2(%arg0: i32) -> (i32, i32) {
    %c0_i32 = arith.constant 0 : i32
    %c0_i32_0 = arith.constant 0 : i32
    %c0_i32_1 = arith.constant 0 : i32
    return %c0_i32, %c0_i32_0 : i32, i32
  }
  func.func @transform_3(%arg0: i32) -> (i32, i32) {
    %c0_i32 = arith.constant 0 : i32
    %c0_i32_0 = arith.constant 0 : i32
    return %arg0, %c0_i32 : i32, i32
  }
}

</mosaic_0001>

<bundles_post_ra>
// kernel: all_forward.1
= control target key start
LH: loop header
LB: loop body
LE: loop exit
PB: predicated region body
PF: predicated region fallthrough
CT: control target
= control target key end

     0   :  { %vm28_vm0 = vcmask 261120   ;;  %s573_s0 = inlined_call_operand.vmem [shape: f32[16,32], index: 0, kind: input, shape index: {}]   ;;  %s574_s1 = inlined_call_operand.vmem [shape: f32[32,32], index: 1, kind: input, shape index: {}]   ;;  %s575_s2 = inlined_call_operand.vmem [shape: f32[1,32], index: 2, kind: input, shape index: {}]   ;;  %s576_s3 = inlined_call_operand.hbm [shape: f32[16,32], index: 3, kind: output, shape index: {}]  }
   0x1   :  { %v17_v0 = vld [vmem:[%s574_s1] sm:$0xff]  ;;  %v18_v1 = vld [vmem:[%s574_s1 + $0x8] sm:$0xff]  ;;  %v19_v2 = vld [vmem:[%s574_s1 + $0x10] sm:$0xff] }
   0x2   :  { %v448_v3 = vpack.c.bf16 %v18_v1, %v17_v0  ;;  %v20_v4 = vld [vmem:[%s574_s1 + $0x18] sm:$0xff]  ;;  %v15_v5 = vld [vmem:[%s573_s0] sm:$0xff] }
   0x3   :  { %v452_v6 = vpack.c.bf16 %v20_v4, %v19_v2  ;;  %412 = vmatprep.mubr.msk.f32.mxu0 %vm28_vm0, %v15_v5 }
   0x4   :  { %8 = vsyncpa [#allocation3], 0  ;;  %449 = vmatprep.subr.bf16.mxu0 %v448_v3  ;;  %457 = vmatprep.subr.bf16.mxu1 %v448_v3  ;;  %v16_v7 = vld [vmem:[%s573_s0 + $0x8] sm:$0xff]  ;;  %v371_v8 = vld [vmem:[%s575_s2] ss:$0 sm:$0xff]  ;;  %s507_s0 = smov [#allocation2]  }
   0x5   :  { %451 = vmatpush3.bf16.msra.mxu0 %v448_v3  ;;  %459 = vmatpush3.bf16.msra.mxu1 %v448_v3  ;;  %s360_s2 = sshll.u32 %s507_s0, 4  ;;  %s361_s2 = int_to_ptr.vmem [resolvable:$true] %s360_s2 }
   0x6   :  { %453 = vmatprep.subr.bf16.mxu0 %v452_v6  ;;  %461 = vmatprep.subr.bf16.mxu1 %v452_v6  ;;  %s483_s25 = scalar_lea.vmem %s361_s2, 256  ;;  %p488_p1 = scmp.lt.s32.totalorder %s361_s2, %s361_s2 }
   0x7   :  { %p484_p0 = scmp.ne.s32.totalorder %s361_s2, %s483_s25  ;;  %p489_p2 = scmp.lt.s32.totalorder %s483_s25, %s483_s25 }
   0x9   :  { %455 = vmatpush3.bf16.msra.mxu0 %v452_v6  ;;  %463 = vmatpush3.bf16.msra.mxu1 %v452_v6  ;;  %p490_p3 = por %p489_p2, %p488_p1 }
   0xa   :  { %465 = vmatprep.subr.bf16.mxu0 %v448_v3  ;;  %473 = vmatprep.subr.bf16.mxu1 %v448_v3 }
   0xb   :  { %p491_p4 = pnand %p490_p3, %p484_p0 }
   0xc   :  { %413 = vmatmul.mubr.msk.f32.vlgmr.msra.gmra.mrb[0].mxu0 %vm28_vm0, %v16_v7 }
   0xd   :  { %467 = vmatpush3.bf16.msra.mxu0 %v448_v3 }
   0xe   :  { %469 = vmatprep.subr.bf16.mxu0 %v452_v6 }
  0x11   :  { %471 = vmatpush3.bf16.msra.mxu0 %v452_v6 }
  0xdf   :  { %v414_v9 = vpop.f32.mrb[0].mxu0 }
  0xe0   :  { %v101_v10 = vpop.f32.mrb[1].mxu0  ;;  %v107_v12 = vadd.f32 %v414_v9, %v371_v8 }
  0xe1   :  { %v102_v11 = vadd.f32 %v371_v8, %v101_v10 }
  0xe3   :  { %423 = vmatprep.mubr.msk.f32.mxu1 %vm28_vm0, %v102_v11 }
  0xe4   :  { %424 = vmatmul.mubr.msk.f32.vlgmr.msra.gmra.mrb[0].mxu1 %vm28_vm0, %v107_v12 }
  0xe5   :  { %475 = vmatpush3.bf16.msra.mxu1 %v448_v3 }
  0xe6   :  { %477 = vmatprep.subr.bf16.mxu1 %v452_v6 }
  0xe9   :  { %479 = vmatpush3.bf16.msra.mxu1 %v452_v6 }
 0x1b7   :  { %v425_v13 = vpop.f32.mrb[0].mxu1 }
 0x1b8   :  { %v182_v14 = vpop.f32.mrb[1].mxu1  ;;  %v188_v16 = vadd.f32 %v425_v13, %v371_v8 }
 0x1b9   :  { %v183_v15 = vadd.f32 %v371_v8, %v182_v14 }
 0x1bb   :  { %434 = vmatprep.mubr.msk.f32.mxu0 %vm28_vm0, %v183_v15 }
 0x1bc   :  { %435 = vmatmul.mubr.msk.f32.vlgmr.msra.gmra.mrb[2].mxu0 %vm28_vm0, %v188_v16 }
 0x28f   :  { %v436_v17 = vpop.f32.mrb[2].mxu0 }
 0x290   :  { %v263_v18 = vpop.f32.mrb[3].mxu0  ;;  %v269_v20 = vadd.f32 %v436_v17, %v371_v8 }
 0x291   :  { %v264_v19 = vadd.f32 %v371_v8, %v263_v18 }
 0x293   :  { %445 = vmatprep.mubr.msk.f32.mxu1 %vm28_vm0, %v264_v19 }
 0x294   :  { %446 = vmatmul.mubr.msk.f32.vlgmr.msra.gmra.mrb[2].mxu1 %vm28_vm0, %v269_v20 }
 0x367   :  { %v447_v21 = vpop.f32.mrb[2].mxu1 }
 0x368   :  { %v350_v22 = vadd.f32 %v447_v21, %v371_v8  ;;  %v344_v23 = vpop.f32.mrb[3].mxu1 }
 0x369   :  { %v345_v24 = vadd.f32 %v371_v8, %v344_v23 }
 0x36a   :  { %354 = vst.msk [vmem:[#allocation2 + $0x8] sm:$0xff] %vm28_vm0, %v350_v22 }
 0x36b   :  { %353 = vst.msk [vmem:[#allocation2] sm:$0xff] %vm28_vm0, %v345_v24 }
 0x36c   :  { %494 = shalt.err (!%p491_p4)
}
 0x36d   :  { %s495_s28 = scalar_lea.hbm %s576_s3, 256 }
 0x36e   :  { %p496_p5 = scmp.ne.s32.totalorder %s576_s3, %s495_s28  ;;  %p499_p6 = scmp.lt.u32.totalorder %s495_s28, %s576_s3 }
 0x370   :  { %p501_p7 = pnand %p499_p6, %p496_p5 }
 0x372   :  { %504 = shalt.err (!%p501_p7)
}
 0x373   :  { %s508_s6 = smov 128   ;;  %s509_s7 = smov 8  }
 0x374   :  { %366 = dma.vmem_to_hbm [thread:$0]  %s361_s2, 256, %s576_s3, [#allocation3], %s508_s6, %s508_s6, %s509_s7  }
 0x375   :  { %505 = dma.done.wait [#allocation3], 256  }
 0x376   :  { %506 = vsyncadd [#allocation3], 4294967040 }
 0x377   :  { %370 = vsyncpa [#allocation3], 1 }

</bundles_post_ra>
